<compile_context>
chip_gen: v6e
topology: v6e:2x2x1
jax: 0.10.0
libtpu: 0.0.40
codegen_flags: <defaults>
</compile_context>

<pallas_src>
import jax
import jax.numpy as jnp
from jax.experimental import pallas as pl
from jax.experimental.pallas import tpu as pltpu


def critic_kernel(x_ref, w1_ref, w2_ref, bw_ref, b3_ref, o_ref):
    cdt = w1_ref.dtype                                # bf16 (or f32 opt-out)
    x = x_ref[...]                                    # [tb, S]  f32

    bw = bw_ref[...]                                  # [3, W]   f32 (resident)
    b1 = bw[0:1, :]                                   # [1, W]
    b2 = bw[1:2, :]
    w3 = bw[2:3, :]

    # Layer 1: tanh(x @ W1 + b1)   -- native bf16 MXU pass, f32 accumulation.
    h1 = jnp.tanh(
        jnp.dot(x.astype(cdt), w1_ref[...], preferred_element_type=jnp.float32)
        + b1
    )
    # Layer 2: tanh(h1 @ W2 + b2)
    h2 = jnp.tanh(
        jnp.dot(h1.astype(cdt), w2_ref[...], preferred_element_type=jnp.float32)
        + b2
    )
    # Layer 3 (value head): [1, W] x [tb, W]^T -> [1, tb].  Batch lands on the
    # lane axis, so the store below is a full-lane (unmasked) vst.
    v = jax.lax.dot_general(
        w3.astype(cdt), h2.astype(cdt),
        (((1,), (1,)), ((), ())),
        preferred_element_type=jnp.float32,
    ) + b3_ref[0]
    o_ref[...] = v.astype(o_ref.dtype)                # [1, tb]


def critic_forward(state, w1, b1, w2, b2, w3, b3, *, tile_b=2048,
                   weights_dtype=jnp.bfloat16):
    """state: [B, state_dim] f32.  w1: [state_dim, W], w2: [W, W],
    w3: [1, W] (row vector), b1/b2: [1, W], b3: [1].  Returns [B, 1] f32."""
    B, state_dim = state.shape
    net_width = w1.shape[1]

    # Compute-dtype weights for the MXU (bf16 by default, f32 opt-out).
    w1c = w1.astype(weights_dtype)
    w2c = w2.astype(weights_dtype)
    # Pack the small resident operands into a single [3, W] f32 block.
    bw = jnp.concatenate(
        [b1.reshape(1, net_width), b2.reshape(1, net_width),
         w3.reshape(1, net_width)], axis=0).astype(jnp.float32)
    b3s = b3.reshape(1).astype(jnp.float32)           # SMEM scalar

    # Batch tile: multiple of 128 (it is the lane axis of the output block),
    # clamped to the 128-padded batch; pad batch so the grid divides evenly.
    tb = max(128, (int(tile_b) // 128) * 128)
    b_ceil = ((B + 127) // 128) * 128
    tb = min(tb, b_ceil)
    b_pad = ((B + tb - 1) // tb) * tb
    x = state if b_pad == B else jnp.pad(state, ((0, b_pad - B), (0, 0)))

    resident = lambda i: (0, 0)                       # same block every step

    wbytes = jnp.dtype(weights_dtype).itemsize
    cost = pl.CostEstimate(
        flops=2 * b_pad * (state_dim * net_width
                           + net_width * net_width + net_width),
        transcendentals=2 * b_pad * net_width,
        bytes_accessed=(b_pad * state_dim * 4
                        + (state_dim * net_width + net_width * net_width) * wbytes
                        + 3 * net_width * 4 + 4
                        + b_pad * 4),
    )

    out = pl.pallas_call(
        critic_kernel,
        out_shape=jax.ShapeDtypeStruct((1, b_pad), jnp.float32),
        grid=(b_pad // tb,),
        in_specs=[
            pl.BlockSpec((tb, state_dim), lambda i: (i, 0)),       # activations
            pl.BlockSpec((state_dim, net_width), resident),        # W1 (bf16)
            pl.BlockSpec((net_width, net_width), resident),        # W2 (bf16)
            pl.BlockSpec((3, net_width), resident),                # b1 | b2 | w3
            pl.BlockSpec(memory_space=pltpu.MemorySpace.SMEM),     # b3 scalar
        ],
        out_specs=pl.BlockSpec((1, tb), lambda i: (0, i)),         # lane-dense
        compiler_params=pltpu.CompilerParams(
            # TODO(synk): on v7x, pltpu.CORE_PARALLEL (or pl.core_map over a
            # 2-core mesh) would split the batch across both TensorCores.
            dimension_semantics=("parallel",),
            vmem_limit_bytes=32 * 1024 * 1024,
        ),
        cost_estimate=cost,
    )(x, w1c, w2c, bw, b3s)

    return out[0, :B].reshape(B, 1)


def init_params(key, state_dim, net_width):
    """Deterministic init mimicking nn.Linear's U(-1/sqrt(fan_in), 1/sqrt(fan_in))."""
    ks = jax.random.split(key, 6)

    def linear(kw, kb, fan_in, fan_out):
        bound = 1.0 / jnp.sqrt(fan_in)
        # W1/W2 stored as [in, out] (transposed vs PyTorch) so the kernel does x @ W.
        w = jax.random.uniform(kw, (fan_in, fan_out), jnp.float32, -bound, bound)
        b = jax.random.uniform(kb, (1, fan_out), jnp.float32, -bound, bound)
        return w, b

    w1, b1 = linear(ks[0], ks[1], state_dim, net_width)
    w2, b2 = linear(ks[2], ks[3], net_width, net_width)
    # Value head stored as a row vector [1, net_width] (PyTorch C3.weight layout)
    # plus a scalar bias.
    bound3 = 1.0 / jnp.sqrt(net_width)
    w3 = jax.random.uniform(ks[4], (1, net_width), jnp.float32, -bound3, bound3)
    b3 = jax.random.uniform(ks[5], (1,), jnp.float32, -bound3, bound3)
    return w1, b1, w2, b2, w3, b3


def critic_reference(state, w1, b1, w2, b2, w3, b3):
    """Pure-f32 reference with the exact PyTorch Critic semantics."""
    h1 = jnp.tanh(state @ w1 + b1)
    h2 = jnp.tanh(h1 @ w2 + b2)
    return h2 @ w3.reshape(-1, 1) + b3.reshape(1)


if __name__ == "__main__":
    key = jax.random.PRNGKey(0)
    k_state, k_params, k_state2 = jax.random.split(key, 3)

    state_dim = 16   # small state dimension
    net_width = 128  # module default
    params = init_params(k_params, state_dim, net_width)

    # Small batch: single grid step.
    B = 8
    state = jax.random.normal(k_state, (B, state_dim), dtype=jnp.float32)
    out = jax.block_until_ready(critic_forward(state, *params))
    ref = critic_reference(state, *params)
    assert out.shape == (B, 1)
    err = float(jnp.max(jnp.abs(out - ref)))
    assert err < 5e-2, err   # bf16 MXU path vs f32 reference

    # Ragged batch exercising the batch grid: padding + weights resident across steps.
    B2 = 300
    state2 = jax.random.normal(k_state2, (B2, state_dim), dtype=jnp.float32)
    out2 = jax.block_until_ready(critic_forward(state2, *params, tile_b=128))
    ref2 = critic_reference(state2, *params)
    assert out2.shape == (B2, 1)
    err2 = float(jnp.max(jnp.abs(out2 - ref2)))
    assert err2 < 5e-2, err2

    # f32 weight opt-out (no bf16 quantization of the parameters).
    out3 = jax.block_until_ready(
        critic_forward(state2, *params, weights_dtype=jnp.float32))
    err3 = float(jnp.max(jnp.abs(out3 - ref2)))
    assert err3 < 2e-2, err3

    print("KERNEL_OK")
</pallas_src>

<mosaic_0001>
module attributes {stable_mosaic.version = 11 : i64} {
  func.func @critic_kernel(%arg0: i32, %arg1: memref<128x16xf32, #tpu.memory_space<vmem>>, %arg2: memref<16x128xbf16, #tpu.memory_space<vmem>>, %arg3: memref<128x128xbf16, #tpu.memory_space<vmem>>, %arg4: memref<3x128xf32, #tpu.memory_space<vmem>>, %arg5: memref<1xf32, #tpu.memory_space<smem>>, %arg6: memref<1x128xf32, #tpu.memory_space<vmem>>) attributes {dimension_semantics = [#tpu.dimension_semantics<parallel>], iteration_bounds = array<i64: 1>, scalar_prefetch = 0 : i64, scratch_operands = 0 : i64, tpu.core_type = #tpu.core_type<tc>, window_params = [{transform_indices = @transform_0, window_bounds = array<i64: 128, 16>}, {pipeline_mode = #tpu.pipeline_mode<synchronous>, transform_indices = @transform_1, window_bounds = array<i64: 16, 128>}, {pipeline_mode = #tpu.pipeline_mode<synchronous>, transform_indices = @transform_2, window_bounds = array<i64: 128, 128>}, {pipeline_mode = #tpu.pipeline_mode<synchronous>, transform_indices = @transform_3, window_bounds = array<i64: 3, 128>}, {transform_indices = @transform_4, window_bounds = array<i64: 1>}, {transform_indices = @transform_5, window_bounds = array<i64: 1, 128>}]} {
    %c0 = arith.constant 0 : index
    %c0_0 = arith.constant 0 : index
    %0 = vector.load %arg1[%c0, %c0_0] : memref<128x16xf32, #tpu.memory_space<vmem>>, vector<128x16xf32>
    %c0_1 = arith.constant 0 : index
    %c0_2 = arith.constant 0 : index
    %1 = vector.load %arg4[%c0_1, %c0_2] : memref<3x128xf32, #tpu.memory_space<vmem>>, vector<3x128xf32>
    %2 = vector.extract_strided_slice %1 {offsets = [0, 0], sizes = [1, 128], strides = [1, 1]} : vector<3x128xf32> to vector<1x128xf32>
    %3 = vector.extract_strided_slice %1 {offsets = [1, 0], sizes = [1, 128], strides = [1, 1]} : vector<3x128xf32> to vector<1x128xf32>
    %4 = vector.extract_strided_slice %1 {offsets = [2, 0], sizes = [1, 128], strides = [1, 1]} : vector<3x128xf32> to vector<1x128xf32>
    %5 = arith.truncf %0 : vector<128x16xf32> to vector<128x16xbf16>
    %c0_3 = arith.constant 0 : index
    %c0_4 = arith.constant 0 : index
    %6 = vector.load %arg2[%c0_3, %c0_4] : memref<16x128xbf16, #tpu.memory_space<vmem>>, vector<16x128xbf16>
    %cst = arith.constant dense<0.000000e+00> : vector<128x128xf32>
    %7 = tpu.matmul %5, %6, %cst {dimension_numbers = #tpu.dot_dimension_numbers<[1], [0], [0], [1], [0, 0, 1, 1], [], []>} : vector<128x16xbf16>, vector<16x128xbf16>, vector<128x128xf32> -> vector<128x128xf32>
    %8 = vector.broadcast %2 : vector<1x128xf32> to vector<128x128xf32>
    %9 = arith.addf %7, %8 : vector<128x128xf32>
    %10 = math.tanh %9 : vector<128x128xf32>
    %11 = arith.truncf %10 : vector<128x128xf32> to vector<128x128xbf16>
    %c0_5 = arith.constant 0 : index
    %c0_6 = arith.constant 0 : index
    %12 = vector.load %arg3[%c0_5, %c0_6] : memref<128x128xbf16, #tpu.memory_space<vmem>>, vector<128x128xbf16>
    %cst_7 = arith.constant dense<0.000000e+00> : vector<128x128xf32>
    %13 = tpu.matmul %11, %12, %cst_7 {dimension_numbers = #tpu.dot_dimension_numbers<[1], [0], [0], [1], [0, 0, 1, 1], [], []>} : vector<128x128xbf16>, vector<128x128xbf16>, vector<128x128xf32> -> vector<128x128xf32>
    %14 = vector.broadcast %3 : vector<1x128xf32> to vector<128x128xf32>
    %15 = arith.addf %13, %14 : vector<128x128xf32>
    %16 = math.tanh %15 : vector<128x128xf32>
    %17 = arith.truncf %4 : vector<1x128xf32> to vector<1x128xbf16>
    %18 = arith.truncf %16 : vector<128x128xf32> to vector<128x128xbf16>
    %cst_8 = arith.constant dense<0.000000e+00> : vector<1x128xf32>
    %19 = tpu.matmul %17, %18, %cst_8 {dimension_numbers = #tpu.dot_dimension_numbers<[1], [1], [0], [0], [0, 0, 1, 0], [], []>} : vector<1x128xbf16>, vector<128x128xbf16>, vector<1x128xf32> -> vector<1x128xf32>
    %c0_9 = arith.constant 0 : index
    %20 = memref.load %arg5[%c0_9] : memref<1xf32, #tpu.memory_space<smem>>
    %21 = vector.broadcast %20 : f32 to vector<1x128xf32>
    %22 = arith.addf %19, %21 : vector<1x128xf32>
    %c0_10 = arith.constant 0 : index
    %c0_11 = arith.constant 0 : index
    %23 = vector.load %arg6[%c0_10, %c0_11] : memref<1x128xf32, #tpu.memory_space<vmem>>, vector<1x128xf32>
    tpu.vector_store %arg6[%c0_10, %c0_11], %22 {strides = array<i32>} : memref<1x128xf32, #tpu.memory_space<vmem>>, vector<1x128xf32>,
    return
  }
  func.func @transform_0(%arg0: i32) -> (i32, i32) {
    %c0_i32 = arith.constant 0 : i32
    %c0_i32_0 = arith.constant 0 : i32
    return %arg0, %c0_i32 : i32, i32
  }
  func.func @transform_1(%arg0: i32) -> (i32, i32) {
    %c0_i32 = arith.constant 0 : i32
    %c0_i32_0 = arith.constant 0 : i32
    %c0_i32_1 = arith.constant 0 : i32
    return %c0_i32, %c0_i32_0 : i32, i32
  }
  func.func @transform_2(%arg0: i32) -> (i32, i32) {
    %c0_i32 = arith.constant 0 : i32
    %c0_i32_0 = arith.constant 0 : i32
    %c0_i32_1 = arith.constant 0 : i32
    return %c0_i32, %c0_i32_0 : i32, i32
  }
  func.func @transform_3(%arg0: i32) -> (i32, i32) {
    %c0_i32 = arith.constant 0 : i32
    %c0_i32_0 = arith.constant 0 : i32
    %c0_i32_1 = arith.constant 0 : i32
    return %c0_i32, %c0_i32_0 : i32, i32
  }
  func.func @transform_4(%arg0: i32) -> i32 {
    %c0_i32 = arith.constant 0 : i32
    %c0_i32_0 = arith.constant 0 : i32
    return %c0_i32 : i32
  }
  func.func @transform_5(%arg0: i32) -> (i32, i32) {
    %c0_i32 = arith.constant 0 : i32
    %c0_i32_0 = arith.constant 0 : i32
    return %c0_i32, %arg0 : i32, i32
  }
}

</mosaic_0001>

<bundles_post_ra>
// kernel: tpu_custom_call.1
= control target key start
LH: loop header
LB: loop body
LE: loop exit
PB: predicated region body
PF: predicated region fallthrough
CT: control target
= control target key end

     0   :  { %vm60_vm0 = vcmask 130048   ;;  %s849_s0 = inlined_call_operand.vmem [shape: f32[128,16], index: 0, kind: input, shape index: {}]   ;;  %s850_s1 = inlined_call_operand.vmem [shape: bf16[16,128], index: 1, kind: input, shape index: {}]   ;;  %s851_s2 = inlined_call_operand.vmem [shape: bf16[128,128], index: 2, kind: input, shape index: {}]   ;;  %s852_s3 = inlined_call_operand.vmem [shape: f32[3,128], index: 3, kind: input, shape index: {}]   ;;  %s853_s4 = inlined_call_operand.<no memory space> [shape: f32[1], index: 4, kind: input, shape index: {}]   ;;  %s854_s5 = inlined_call_operand.hbm [shape: f32[1,128], index: 5, kind: output, shape index: {}]  }
   0x1   :  { %v580_v0 = vld [vmem:[%s850_s1] sm:$0xff]   ;;  %v24_v2 = vld [vmem:[%s849_s0 + $0x8] sm:$0xff]  ;;  %v25_v3 = vld [vmem:[%s849_s0 + $0x10] sm:$0xff] }
   0x2   :  { %v23_v1 = vld [vmem:[%s849_s0] sm:$0xff]  ;;  %507 = vmatprep.subr.bf16.mxu1 %v580_v0  ;;  %v26_v5 = vld [vmem:[%s849_s0 + $0x18] sm:$0xff]  ;;  %v28_v7 = vld [vmem:[%s849_s0 + $0x28] sm:$0xff] }
   0x3   :  { %v40_v4 = vpack.c.bf16 %v24_v2, %v23_v1  ;;  %v27_v6 = vld [vmem:[%s849_s0 + $0x20] sm:$0xff]  ;;  %508 = vmatpush3.bf16.msra.mxu1 %v580_v0  ;;  %v41_v8 = vpack.c.bf16 %v26_v5, %v25_v3  ;;  %v29_v10 = vld [vmem:[%s849_s0 + $0x30] sm:$0xff]  ;;  %v30_v11 = vld [vmem:[%s849_s0 + $0x38] sm:$0xff] }
   0x4   :  { %v42_v9 = vpack.c.bf16 %v28_v7, %v27_v6  ;;  %v31_v12 = vld [vmem:[%s849_s0 + $0x40] sm:$0xff]  ;;  %v581_v13 = vld [vmem:[%s851_s2 + $0x38] sm:$0xff]   ;;  %v32_v14 = vld [vmem:[%s849_s0 + $0x48] sm:$0xff]  ;;  %v43_v16 = vpack.c.bf16 %v30_v11, %v29_v10 }
   0x5   :  { %509 = vmatprep.mubr.msk.bf16.mxu1 %vm60_vm0, %v40_v4  ;;  %v582_v15 = vld [vmem:[%s851_s2 + $0x30] sm:$0xff]   ;;  %525 = vmatprep.subr.bf16.mxu1 %v581_v13  ;;  %v44_v17 = vpack.c.bf16 %v32_v14, %v31_v12 }
   0x6   :  { %510 = vmatmul.mubr.msk.bf16.vlgmr.msra.gmra.mxu1 %vm60_vm0, %v41_v8 }
   0x7   :  { %513 = vmatprep.mubr.msk.bf16.mxu1 %vm60_vm0, %v42_v9  ;;  %526 = vmatpush3.bf16.msra.mxu1 %v581_v13 }
   0x8   :  { %527 = vmatprep.subr.bf16.mxu1 %v582_v15 }
   0x9   :  { %11 = vsyncpa [#allocation4], 0  ;;  %v33_v18 = vld [vmem:[%s849_s0 + $0x50] sm:$0xff]  ;;  %v34_v19 = vld [vmem:[%s849_s0 + $0x58] sm:$0xff]  ;;  %v50_v33 = vlaneseq  ;;  %vm676_vm1 = vmmov 0   ;;  %s677_s17 = smov [#allocation3]  }
   0xa   :  { %v35_v20 = vld [vmem:[%s849_s0 + $0x60] sm:$0xff]  ;;  %v36_v21 = vld [vmem:[%s849_s0 + $0x68] sm:$0xff]  ;;  %v45_v22 = vpack.c.bf16 %v34_v19, %v33_v18  ;;  %v37_v24 = vld [vmem:[%s849_s0 + $0x70] sm:$0xff]  ;;  %s448_s18 = sshll.u32 %s677_s17, 4  ;;  %s449_s18 = int_to_ptr.vmem [resolvable:$true] %s448_s18 }
   0xb   :  { %528 = vmatpush3.bf16.msra.mxu1 %v582_v15  ;;  %v46_v23 = vpack.c.bf16 %v36_v21, %v35_v20  ;;  %v38_v25 = vld [vmem:[%s849_s0 + $0x78] sm:$0xff]  ;;  %v583_v27 = vld [vmem:[%s851_s2 + $0x28] sm:$0xff]   ;;  %v584_v28 = vld [vmem:[%s851_s2 + $0x20] sm:$0xff]   ;;  %v791_v34 = vshrl.u32 %v50_v33, 7  ;;  %s653_s19 = scalar_lea.vmem %s449_s18, 16  ;;  %s657_s20 = scalar_lea.vmem %s449_s18, 32 }
   0xc   :  { %v47_v26 = vpack.c.bf16 %v38_v25, %v37_v24  ;;  %529 = vmatprep.subr.bf16.mxu1 %v583_v27  ;;  %v585_v29 = vld [vmem:[%s851_s2 + $0x18] sm:$0xff]   ;;  %v586_v30 = vld [vmem:[%s851_s2 + $0x10] sm:$0xff]   ;;  %v587_v31 = vld [vmem:[%s851_s2 + $0x8] sm:$0xff]   ;;  %p654_p0 = scmp.ne.s32.totalorder %s449_s18, %s653_s19  ;;  %p658_p1 = scmp.lt.s32.totalorder %s449_s18, %s449_s18 }
   0xd   :  { %v588_v32 = vld [vmem:[%s851_s2] sm:$0xff]   ;;  %v52_v35 = vsub.s32 0, %v791_v34  ;;  %p659_p2 = scmp.lt.s32.totalorder %s657_s20, %s653_s19 }
   0xe   :  { %514 = vmatmul.mubr.msk.bf16.gmra.mxu1 %vm60_vm0, %v43_v16  ;;  %v797_v36 = vld [vmem:[%s852_s3] sm:$0x7] }
   0xf   :  { %517 = vmatprep.mubr.msk.bf16.mxu1 %vm60_vm0, %v44_v17  ;;  %530 = vmatpush3.bf16.msra.mxu1 %v583_v27  ;;  %v53_v38 = vrot.slane %v797_v36, %v52_v35  ;;  %p660_p3 = por %p659_p2, %p658_p1 }
  0x10   :  { %531 = vmatprep.subr.bf16.mxu1 %v584_v28 }
  0x11   :  { %p661_p4 = pnand %p660_p3, %p654_p0 }
  0x13   :  { %532 = vmatpush3.bf16.msra.mxu1 %v584_v28 }
  0x14   :  { %533 = vmatprep.subr.bf16.mxu1 %v585_v29 }
  0x16   :  { %518 = vmatmul.mubr.msk.bf16.gmra.mxu1 %vm60_vm0, %v45_v22 }
  0x17   :  { %521 = vmatprep.mubr.msk.bf16.mxu1 %vm60_vm0, %v46_v23  ;;  %534 = vmatpush3.bf16.msra.mxu1 %v585_v29 }
  0x18   :  { %535 = vmatprep.subr.bf16.mxu1 %v586_v30 }
  0x1b   :  { %536 = vmatpush3.bf16.msra.mxu1 %v586_v30  ;;  %v675_v30 = vmov 0.0  }
  0x1c   :  { %537 = vmatprep.subr.bf16.mxu1 %v587_v31  ;;  %557 = vmatprep.subr.bf16.mxu0 %v675_v30 }
  0x1d   :  { %573 = vmatprep.mubr.msk.bf16.mxu0 %vm676_vm1, %v675_v30 }
  0x1e   :  { %522 = vmatmul.mubr.msk.bf16.gmra.mxu1 %vm60_vm0, %v47_v26 }
  0x1f   :  { %538 = vmatpush3.bf16.msra.mxu1 %v587_v31  ;;  %v224_v31 = vsub.s32 1, %v791_v34 }
  0x20   :  { %539 = vmatprep.subr.bf16.mxu1 %v588_v32 }
  0x23   :  { %540 = vmatpush3.bf16.msra.mxu1 %v588_v32  ;;  %v804_v32 = vrot.slane %v797_v36, %v224_v31 }
  0xc6   :  { %v511_v37 = vpop.f32.mrf.mxu1 }
  0xc7   :  { %v128_v43 = vadd.f32 %v511_v37, %v53_v38 }
  0xc8   :  { %v119_v39 = vpop.f32.mrf.mxu1 }
  0xc9   :  { %v120_v40 = vadd.f32 %v119_v39, %v53_v38 }
  0xca   :  { %v512_v41 = vpop.f32.mrf.mxu1 }
  0xcb   :  { %v131_v42 = vadd.f32 %v512_v41, %v53_v38  ;;  %589 = vtanh.f32 %v120_v40 }
  0xcc   :  { %v122_v44 = vpop.f32.mrf.mxu1 }
  0xcd   :  { %v123_v45 = vadd.f32 %v122_v44, %v53_v38  ;;  %591 = vtanh.f32 %v131_v42 }
  0xce   :  { %v515_v46 = vpop.f32.mrf.mxu1 }
  0xcf   :  { %593 = vtanh.f32 %v123_v45  ;;  %v144_v51 = vadd.f32 %v515_v46, %v53_v38 }
  0xd0   :  { %595 = vtanh.f32 %v128_v43  ;;  %v135_v47 = vpop.f32.mrf.mxu1 }
  0xd1   :  { %v136_v48 = vadd.f32 %v135_v47, %v53_v38 }
  0xd2   :  { %v516_v49 = vpop.f32.mrf.mxu1 }
  0xd3   :  { %v147_v50 = vadd.f32 %v516_v49, %v53_v38  ;;  %597 = vtanh.f32 %v136_v48 }
  0xd4   :  { %v138_v52 = vpop.f32.mrf.mxu1 }
  0xd5   :  { %v139_v53 = vadd.f32 %v138_v52, %v53_v38  ;;  %599 = vtanh.f32 %v147_v50 }
  0xd6   :  { %v519_v54 = vpop.f32.mrf.mxu1 }
  0xd7   :  { %601 = vtanh.f32 %v139_v53  ;;  %v160_v62 = vadd.f32 %v519_v54, %v53_v38 }
  0xd8   :  { %603 = vtanh.f32 %v144_v51  ;;  %v151_v55 = vpop.f32.mrf.mxu1  ;;  %v590_v57 = vpop.eup %589 }
  0xd9   :  { %v152_v56 = vadd.f32 %v151_v55, %v53_v38 }
  0xda   :  { %v520_v58 = vpop.f32.mrf.mxu1  ;;  %v592_v59 = vpop.eup %591 }
  0xdb   :  { %v163_v60 = vadd.f32 %v520_v58, %v53_v38  ;;  %605 = vtanh.f32 %v152_v56 }
  0xdc   :  { %v594_v61 = vpop.eup %593  ;;  %v154_v63 = vpop.f32.mrf.mxu1 }
  0xdd   :  { %v596_v0 = vpop.eup %595  ;;  %v155_v1 = vadd.f32 %v154_v63, %v53_v38  ;;  %v198_v2 = vpack.c.bf16 %v594_v61, %v590_v57  ;;  %607 = vtanh.f32 %v163_v60 }
  0xde   :  { %v523_v3 = vpop.f32.mrf.mxu1  ;;  %v199_v4 = vpack.c.bf16 %v592_v59, %v596_v0 }
  0xdf   :  { %609 = vtanh.f32 %v155_v1  ;;  %541 = vmatprep.mubr.bf16.mxu1 %v198_v2  ;;  %v176_v12 = vadd.f32 %v523_v3, %v53_v38 }
  0xe0   :  { %611 = vtanh.f32 %v160_v62  ;;  %v167_v5 = vpop.f32.mrf.mxu1  ;;  %542 = vmatmul.mubr.bf16.vlgmr.msra.gmra.mxu1 %v199_v4  ;;  %v598_v7 = vpop.eup %597 }
  0xe1   :  { %v168_v6 = vadd.f32 %v167_v5, %v53_v38 }
  0xe2   :  { %v524_v8 = vpop.f32.mrf.mxu1  ;;  %v600_v9 = vpop.eup %599 }
  0xe3   :  { %v179_v10 = vadd.f32 %v524_v8, %v53_v38  ;;  %613 = vtanh.f32 %v168_v6 }
  0xe4   :  { %v602_v11 = vpop.eup %601  ;;  %v170_v13 = vpop.f32.mrf.mxu1 }
  0xe5   :  { %v604_v14 = vpop.eup %603  ;;  %v171_v15 = vadd.f32 %v170_v13, %v53_v38  ;;  %v200_v16 = vpack.c.bf16 %v602_v11, %v598_v7  ;;  %615 = vtanh.f32 %v179_v10 }
  0xe6   :  { %v201_v17 = vpack.c.bf16 %v600_v9, %v604_v14 }
  0xe7   :  { %617 = vtanh.f32 %v171_v15  ;;  %545 = vmatprep.mubr.bf16.mxu1 %v200_v16 }
  0xe8   :  { %619 = vtanh.f32 %v176_v12  ;;  %546 = vmatmul.mubr.bf16.gmra.mxu1 %v201_v17  ;;  %v606_v18 = vpop.eup %605 }
  0xea   :  { %v608_v19 = vpop.eup %607 }
  0xec   :  { %v610_v20 = vpop.eup %609 }
  0xed   :  { %v612_v21 = vpop.eup %611  ;;  %v202_v22 = vpack.c.bf16 %v610_v20, %v606_v18 }
  0xee   :  { %v203_v23 = vpack.c.bf16 %v608_v19, %v612_v21 }
  0xef   :  { %549 = vmatprep.mubr.bf16.mxu1 %v202_v22 }
  0xf0   :  { %550 = vmatmul.mubr.bf16.gmra.mxu1 %v203_v23  ;;  %v614_v24 = vpop.eup %613 }
  0xf2   :  { %v616_v25 = vpop.eup %615 }
  0xf4   :  { %v618_v26 = vpop.eup %617 }
  0xf5   :  { %v620_v27 = vpop.eup %619  ;;  %v204_v28 = vpack.c.bf16 %v618_v26, %v614_v24  ;;  %v387_v26 = vpack.c.bf16 %v797_v36, %v797_v36 }
  0xf6   :  { %v205_v29 = vpack.c.bf16 %v616_v25, %v620_v27 }
  0xf7   :  { %553 = vmatprep.mubr.bf16.mxu1 %v204_v28  ;;  %v399_v27 = vrot.slane %v387_v26, 1  ;;  %v397_v28 = vstv %s853_s4 }
  0xf8   :  { %554 = vmatmul.mubr.bf16.gmra.mxu1 %v205_v29 }
 0x1a0   :  { %v543_v33 = vpop.f32.mrf.mxu1 }
 0x1a1   :  { %v317_v35 = vadd.f32 %v543_v33, %v804_v32 }
 0x1a2   :  { %v308_v37 = vpop.f32.mrf.mxu1 }
 0x1a3   :  { %v309_v38 = vadd.f32 %v308_v37, %v804_v32  ;;  %621 = vtanh.f32 %v317_v35 }
 0x1a4   :  { %v544_v39 = vpop.f32.mrf.mxu1 }
 0x1a5   :  { %v320_v40 = vadd.f32 %v544_v39, %v804_v32 }
 0x1a6   :  { %v311_v41 = vpop.f32.mrf.mxu1 }
 0x1a7   :  { %623 = vtanh.f32 %v320_v40  ;;  %v312_v42 = vadd.f32 %v311_v41, %v804_v32 }
 0x1a8   :  { %625 = vtanh.f32 %v309_v38  ;;  %v547_v43 = vpop.f32.mrf.mxu1 }
 0x1a9   :  { %627 = vtanh.f32 %v312_v42  ;;  %v333_v12 = vadd.f32 %v547_v43, %v804_v32 }
 0x1aa   :  { %v324_v34 = vpop.f32.mrf.mxu1 }
 0x1ab   :  { %v325_v17 = vadd.f32 %v324_v34, %v804_v32 }
 0x1ac   :  { %v548_v44 = vpop.f32.mrf.mxu1 }
 0x1ad   :  { %v336_v10 = vadd.f32 %v548_v44, %v804_v32 }
 0x1ae   :  { %v327_v45 = vpop.f32.mrf.mxu1 }
 0x1af   :  { %v328_v15 = vadd.f32 %v327_v45, %v804_v32 }
 0x1b0   :  { %v551_v46 = vpop.f32.mrf.mxu1  ;;  %v810_v48 = vpop.eup %621 }
 0x1b1   :  { %v349_v2 = vadd.f32 %v551_v46, %v804_v32 }
 0x1b2   :  { %v340_v47 = vpop.f32.mrf.mxu1 }
 0x1b3   :  { %v341_v7 = vadd.f32 %v340_v47, %v804_v32 }
 0x1b4   :  { %v812_v49 = vpop.eup %623  ;;  %v552_v50 = vpop.f32.mrf.mxu1 }
 0x1b5   :  { %v814_v51 = vpop.eup %625  ;;  %v389_v52 = vpack.c.bf16 %v812_v49, %v810_v48  ;;  %v352_v0 = vadd.f32 %v552_v50, %v804_v32 }
 0x1b6   :  { %v818_v53 = vpop.eup %627  ;;  %v343_v54 = vpop.f32.mrf.mxu1 }
 0x1b7   :  { %v388_v55 = vpack.c.bf16 %v818_v53, %v814_v51  ;;  %v344_v5 = vadd.f32 %v343_v54, %v804_v32 }
 0x1b8   :  { %v555_v56 = vpop.f32.mrf.mxu1 }
 0x1b9   :  { %v365_v57 = vadd.f32 %v555_v56, %v804_v32 }
 0x1ba   :  { %v356_v58 = vpop.f32.mrf.mxu1 }
 0x1bb   :  { %629 = vtanh.f32 %v365_v57  ;;  %v357_v63 = vadd.f32 %v356_v58, %v804_v32 }
 0x1bc   :  { %v556_v59 = vpop.f32.mrf.mxu1 }
 0x1bd   :  { %v368_v60 = vadd.f32 %v556_v59, %v804_v32 }
 0x1be   :  { %v359_v61 = vpop.f32.mrf.mxu1 }
 0x1bf   :  { %631 = vtanh.f32 %v368_v60  ;;  %v360_v62 = vadd.f32 %v359_v61, %v804_v32 }
 0x1c1   :  { %633 = vtanh.f32 %v360_v62 }
 0x1c2   :  { %635 = vtanh.f32 %v357_v63 }
 0x1c3   :  { %637 = vtanh.f32 %v352_v0 }
 0x1c4   :  { %639 = vtanh.f32 %v349_v2 }
 0x1c5   :  { %641 = vtanh.f32 %v344_v5 }
 0x1c6   :  { %643 = vtanh.f32 %v341_v7 }
 0x1c7   :  { %645 = vtanh.f32 %v336_v10 }
 0x1c8   :  { %v630_v1 = vpop.eup %629  ;;  %647 = vtanh.f32 %v333_v12 }
 0x1c9   :  { %649 = vtanh.f32 %v328_v15 }
 0x1ca   :  { %651 = vtanh.f32 %v325_v17 }
 0x1cc   :  { %v632_v3 = vpop.eup %631 }
 0x1cd   :  { %v395_v4 = vpack.c.bf16 %v632_v3, %v630_v1 }
 0x1ce   :  { %v634_v6 = vpop.eup %633 }
 0x1cf   :  { %558 = vmatpush3.bf16.xpose.msra.mxu0 %v395_v4  ;;  %v636_v8 = vpop.eup %635 }
 0x1d0   :  { %559 = vmatprep.subr.bf16.mxu0 %v675_v30  ;;  %v394_v9 = vpack.c.bf16 %v634_v6, %v636_v8  ;;  %v638_v11 = vpop.eup %637 }
 0x1d1   :  { %v640_v13 = vpop.eup %639 }
 0x1d2   :  { %v393_v14 = vpack.c.bf16 %v638_v11, %v640_v13  ;;  %v642_v16 = vpop.eup %641 }
 0x1d3   :  { %v644_v18 = vpop.eup %643 }
 0x1d4   :  { %v392_v19 = vpack.c.bf16 %v642_v16, %v644_v18  ;;  %v646_v20 = vpop.eup %645 }
 0x1d5   :  { %v648_v21 = vpop.eup %647 }
 0x1d6   :  { %v391_v22 = vpack.c.bf16 %v646_v20, %v648_v21  ;;  %v650_v23 = vpop.eup %649 }
 0x1d7   :  { %560 = vmatpush3.bf16.xpose.msra.mxu0 %v394_v9  ;;  %v652_v24 = vpop.eup %651 }
 0x1d8   :  { %561 = vmatprep.subr.bf16.mxu0 %v675_v30  ;;  %v390_v25 = vpack.c.bf16 %v650_v23, %v652_v24 }
 0x1df   :  { %562 = vmatpush3.bf16.xpose.msra.mxu0 %v393_v14 }
 0x1e0   :  { %563 = vmatprep.subr.bf16.mxu0 %v675_v30 }
 0x1e7   :  { %564 = vmatpush3.bf16.xpose.msra.mxu0 %v392_v19 }
 0x1e8   :  { %565 = vmatprep.subr.bf16.mxu0 %v675_v30 }
 0x1ef   :  { %566 = vmatpush3.bf16.xpose.msra.mxu0 %v391_v22 }
 0x1f0   :  { %567 = vmatprep.subr.bf16.mxu0 %v675_v30 }
 0x1f7   :  { %568 = vmatpush3.bf16.xpose.msra.mxu0 %v390_v25 }
 0x1f8   :  { %569 = vmatprep.subr.bf16.mxu0 %v675_v30 }
 0x1ff   :  { %570 = vmatpush3.bf16.xpose.msra.mxu0 %v389_v52 }
 0x200   :  { %571 = vmatprep.subr.bf16.mxu0 %v675_v30 }
 0x207   :  { %572 = vmatpush3.bf16.xpose.msra.mxu0 %v388_v55 }
 0x20e   :  { %574 = vmatmul.mubr.bf16.vlgmr.msra.gmra.mxu0 %v399_v27 }
 0x2ce   :  { %v435_v29 = vpop.f32.mrf.mxu0 }
 0x2cf   :  { %v436_v31 = vadd.f32 %v435_v29, %v397_v28 }
 0x2d0   :  { %v575_v32 = vpop.f32.mrf.mxu0 }
 0x2d1   :  { %441 = vst [vmem:[#allocation3] sm:$0x1] %v436_v31 }
 0x2d2   :  { %v438_v33 = vpop.f32.mrf.mxu0 }
 0x2d3   :  { %664 = shalt.err (!%p661_p4)
}
 0x2d4   :  { %451 = dma.vmem_to_hbm [thread:$0]  %s449_s18, 16, %s854_s5, [#allocation4]   ;;  %v576_v36 = vpop.f32.mrf.mxu0 }
 0x2d5   :  { %673 = dma.done.wait [#allocation4], 16  }
 0x2d6   :  { %674 = vsyncadd [#allocation4], 4294967280 }
 0x2d7   :  { %455 = vsyncpa [#allocation4], 1 }

</bundles_post_ra>
